<compile_context>
chip_gen: v7x
topology: tpu7x:2x2x1
jax: 0.10.0
libtpu: 0.0.40
codegen_flags: <defaults>
</compile_context>

<pallas_src>
import functools

import jax
import jax.numpy as jnp
from jax import lax
from jax.experimental import pallas as pl
from jax.experimental.pallas import tpu as pltpu


# ------------------------------- small helpers ------------------------------


def _vmem_capacity_bytes():
    """Per-core VMEM capacity; conservative fallback if the query is missing."""
    try:
        info = pltpu.get_tpu_info()
        cap = getattr(info, "vmem_capacity_bytes", None)
        if cap:
            return int(cap)
    except Exception:
        pass
    return 64 << 20        # v7x per-core VMEM (smallest of the three targets)


def _divisor_row_tile(h, w, itemsize, target_bytes):
    """Largest multiple-of-8 divisor of h whose full-width tile <= target_bytes.

    Returns None when h cannot be cleanly row-tiled (h % 8 != 0 or h tiny)."""
    if h % 8 != 0 or h < 16:
        return None
    row_bytes = max(1, w * itemsize)
    max_rows = min(h, max(8, target_bytes // row_bytes))
    max_rows = (max_rows // 8) * 8
    best = None
    t = 8
    while t <= max_rows:
        if h % t == 0:
            best = t
        t += 8
    return best


def _pick_rescale_tile(h, w, itemsize, per_block_bytes):
    """Byte-budgeted (rows, cols) tile for the elementwise rescale kernel."""
    row_bytes = max(1, w * itemsize)
    tr = per_block_bytes // row_bytes
    if tr >= 8:
        tr = min((tr // 8) * 8, h)
        return tr, w                       # full-width, lane-dense row tiles
    # Very wide flattened weights: tile the lane dimension too.
    tr = min(8, h)
    tc = (per_block_bytes // max(1, tr * itemsize) // 128) * 128
    tc = max(128, tc)
    tc = min(tc, w)
    return tr, tc


# ----------------------------- Pallas kernels -------------------------------


def _sn_resident_train_kernel(w_ref, u_ref, v_ref, wout_ref, uout_ref, vout_ref,
                              inv_sc, *, n_power_iterations, eps, norm_bound,
                              tile_rows):
    """Resident W: power iteration + sigma at step 0, per-tile rescale every step."""
    i = pl.program_id(0)

    @pl.when(i == 0)
    def _sigma_and_buffers():
        W = w_ref[...]                               # (h, w), native dtype
        u = u_ref[...].astype(jnp.float32)           # (1, h) lane-dense row
        v = v_ref[...].astype(jnp.float32)           # (1, w) lane-dense row
        eps_f = jnp.float32(eps)

        def one_iter(carry):
            u, v, _ = carry
            # u = normalize(W @ v): W contracted on its last dim (canonical LHS).
            wv = lax.dot_general(W, v.astype(W.dtype), (((1,), (1,)), ((), ())),
                                 preferred_element_type=jnp.float32)    # (h, 1)
            u = jnp.transpose(wv)                                       # (1, h)
            u = u / jnp.maximum(jnp.sqrt(jnp.sum(u * u)), eps_f)
            # v = normalize(W^T @ u): (1,h)@(h,w) -> (1,w); W never transposed.
            wtu = lax.dot_general(u.astype(W.dtype), W, (((1,), (0,)), ((), ())),
                                  preferred_element_type=jnp.float32)   # (1, w)
            n = jnp.sqrt(jnp.sum(wtu * wtu))
            v = wtu / jnp.maximum(n, eps_f)
            # sigma = u . (W v_new) == ||W^T u||  ->  third matvec elided.
            return u, v, n

        carry = (u, v, jnp.zeros((), jnp.float32))
        if n_power_iterations <= 4:
            for _ in range(n_power_iterations):
                carry = one_iter(carry)
        else:
            carry = lax.fori_loop(0, n_power_iterations,
                                  lambda _, c: one_iter(c), carry)
        u, v, sigma = carry
        scale = jnp.maximum(jnp.float32(1.0), sigma / jnp.float32(norm_bound))
        inv_sc[0] = jnp.float32(1.0) / scale
        uout_ref[...] = u
        vout_ref[...] = v

    # Every grid step: rescale one (tile_rows, w) slab of the resident W; the
    # output-tile write-back DMA overlaps the next slab's VPU multiply.
    if tile_rows == w_ref.shape[0]:
        tile = w_ref[...]
    else:
        start = pl.multiple_of(i * tile_rows, tile_rows)
        tile = w_ref[pl.ds(start, tile_rows), :]
    wout_ref[...] = (tile.astype(jnp.float32) * inv_sc[0]).astype(wout_ref.dtype)


def _sn_resident_eval_kernel(w_ref, u_ref, v_ref, wout_ref, inv_sc, *,
                             norm_bound, tile_rows):
    """Eval path: explicit sigma = u . (W v) with stale buffers, tiled rescale."""
    i = pl.program_id(0)

    @pl.when(i == 0)
    def _sigma():
        W = w_ref[...]
        u = u_ref[...].astype(jnp.float32)           # (1, h)
        v = v_ref[...].astype(jnp.float32)           # (1, w)
        wv = lax.dot_general(W, v.astype(W.dtype), (((1,), (1,)), ((), ())),
                             preferred_element_type=jnp.float32)        # (h, 1)
        sigma = jnp.sum(lax.dot_general(u, wv, (((1,), (0,)), ((), ())),
                                        preferred_element_type=jnp.float32))
        scale = jnp.maximum(jnp.float32(1.0), sigma / jnp.float32(norm_bound))
        inv_sc[0] = jnp.float32(1.0) / scale

    if tile_rows == w_ref.shape[0]:
        tile = w_ref[...]
    else:
        start = pl.multiple_of(i * tile_rows, tile_rows)
        tile = w_ref[pl.ds(start, tile_rows), :]
    wout_ref[...] = (tile.astype(jnp.float32) * inv_sc[0]).astype(wout_ref.dtype)


def _sn_stream_power_kernel(w_ref, v_ref, uraw_ref, vout_ref, sig_ref,
                            v_sc, acc_sc, s_sc, *, eps, n_iter):
    """Streamed power iteration for W that does not fit in VMEM.

    grid = (n_iter, num_row_tiles).  Per iteration, ONE pass over W row tiles
    accumulates both W v (raw u rows, emitted per tile) and (W v)^T W
    (= ||Wv|| * W^T u), so each iteration costs a single HBM read of W."""
    it = pl.program_id(0)
    r = pl.program_id(1)
    nr = pl.num_programs(1)
    eps_f = jnp.float32(eps)

    @pl.when(jnp.logical_and(it == 0, r == 0))
    def _init_v():
        v_sc[...] = v_ref[...].astype(jnp.float32)

    @pl.when(r == 0)
    def _reset():
        acc_sc[...] = jnp.zeros_like(acc_sc)
        s_sc[0] = jnp.float32(0.0)

    W = w_ref[...]                                   # (tile_rows, w) native dtype
    v = v_sc[...]                                    # (1, w) f32
    wv = lax.dot_general(W, v.astype(W.dtype), (((1,), (1,)), ((), ())),
                         preferred_element_type=jnp.float32)     # (tile_rows, 1)
    uraw_ref[...] = wv                               # raw (unnormalized) u rows
    s_sc[0] += jnp.sum(wv * wv)                      # running ||W v||^2
    wv_row = jnp.transpose(wv)                       # (1, tile_rows)
    acc_sc[...] += lax.dot_general(wv_row.astype(W.dtype), W,
                                   (((1,), (0,)), ((), ())),
                                   preferred_element_type=jnp.float32)   # (1, w)

    @pl.when(r == nr - 1)
    def _finish_iter():
        denom_u = jnp.maximum(jnp.sqrt(s_sc[0]), eps_f)      # max(||W v||, eps)
        acc = acc_sc[...]                                    # = W^T (W v)
        sigma = jnp.sqrt(jnp.sum(acc * acc)) / denom_u       # = ||W^T u||
        v_new = acc / (denom_u * jnp.maximum(sigma, eps_f))
        v_sc[...] = v_new

        @pl.when(it == n_iter - 1)
        def _finalize():
            vout_ref[...] = v_new
            sig_ref[...] = jnp.reshape(sigma, (1, 1))


def _scale_tile_kernel(s_ref, w_ref, o_ref):
    """Elementwise rescale of one (tr, tc) block by an SMEM scalar (f32 math)."""
    o_ref[...] = (w_ref[...].astype(jnp.float32) * s_ref[0]).astype(o_ref.dtype)


# ------------------------------- plain-JAX glue ------------------------------


def _power_iteration_jax(weight_mat, u, v, n_iter, eps):
    """Plain-JAX power iteration; returns (u, v, sigma) with sigma = ||W^T u||."""
    wm_dtype = weight_mat.dtype
    sigma = jnp.float32(0.0)
    for _ in range(n_iter):
        wv = jnp.dot(weight_mat, v.astype(wm_dtype),
                     preferred_element_type=jnp.float32)
        u = wv / jnp.maximum(jnp.linalg.norm(wv), eps)
        wtu = jnp.dot(u.astype(wm_dtype), weight_mat,
                      preferred_element_type=jnp.float32)
        n = jnp.linalg.norm(wtu)
        v = wtu / jnp.maximum(n, eps)
        sigma = n
    return u, v, sigma


# ---------------------------------- wrapper ----------------------------------


class SpectralNormPallas:
    """JAX/Pallas port of the torch `_SpectralNorm` module.

    forward(weight) = weight / max(1, sigma / norm_bound), power iteration on
    weight.flatten(1) with `dim` moved first.

    NOTE: like the torch module, the `_u`/`_v` buffer update is a Python-side
    side effect of forward(); call eagerly (do not trace `__call__` under
    jax.jit, or the buffer update would capture tracers).
    """

    def __init__(self, weight, n_power_iterations=1, dim=0, eps=1e-12,
                 norm_bound=0.95, key=None, *,
                 resident_vmem_budget=None,       # bytes; None -> ~55% of VMEM
                 min_pallas_bytes=64 << 10,       # below this: plain-jnp forward
                 resident_out_tile_bytes=None,    # force resident output tiling
                 stream_tile_bytes=4 << 20,       # streamed-power W tile target
                 rescale_block_bytes=2 << 20):    # tiled-rescale block target
        ndim = weight.ndim
        if dim >= ndim or dim < -ndim:
            raise IndexError(
                f"Dimension out of range (expected to be in range of "
                f"[-{ndim}, {ndim - 1}] but got {dim})")
        if n_power_iterations <= 0:
            raise ValueError(
                "Expected n_power_iterations to be positive, but got "
                f"n_power_iterations={n_power_iterations}")
        self.dim = dim if dim >= 0 else dim + ndim
        self.eps = float(eps)
        self.norm_bound = float(norm_bound)
        self.training = True

        self._vmem_capacity = _vmem_capacity_bytes()
        self._resident_budget = (int(0.55 * self._vmem_capacity)
                                 if resident_vmem_budget is None
                                 else int(resident_vmem_budget))
        self._min_pallas_bytes = int(min_pallas_bytes)
        self._resident_out_tile_bytes = resident_out_tile_bytes
        self._stream_tile_bytes = int(stream_tile_bytes)
        self._rescale_block_bytes = int(rescale_block_bytes)

        if ndim > 1:
            self.n_power_iterations = int(n_power_iterations)
            weight_mat = self._reshape_weight_to_matrix(weight)
            h, w = weight_mat.shape
            if key is None:
                key = jax.random.PRNGKey(1234)
            k1, k2 = jax.random.split(key)
            u = jax.random.normal(k1, (h,), jnp.float32)
            v = jax.random.normal(k2, (w,), jnp.float32)
            u = u / jnp.maximum(jnp.linalg.norm(u), self.eps)
            v = v / jnp.maximum(jnp.linalg.norm(v), self.eps)
            # __init__-time power method (15 iterations) is one-time setup -> JAX.
            u, v, _ = _power_iteration_jax(weight_mat, u, v, 15, self.eps)
            self._u = u
            self._v = v

    # -- torch.nn.Module-ish conveniences --
    def train(self):
        self.training = True
        return self

    def eval(self):
        self.training = False
        return self

    def right_inverse(self, value):
        return value

    # -- layout plumbing (wrapper-side, plain JAX) --
    def _reshape_weight_to_matrix(self, weight):
        assert weight.ndim > 1
        if self.dim != 0:
            perm = (self.dim,) + tuple(d for d in range(weight.ndim)
                                       if d != self.dim)
            weight = jnp.transpose(weight, perm)
        return weight.reshape(weight.shape[0], -1)

    def _unreshape_matrix_to_weight(self, w_mat, weight_shape):
        if self.dim != 0:
            perm = (self.dim,) + tuple(d for d in range(len(weight_shape))
                                       if d != self.dim)
            permuted_shape = tuple(weight_shape[p] for p in perm)
            inv = [0] * len(perm)
            for i, p in enumerate(perm):
                inv[p] = i
            return jnp.transpose(w_mat.reshape(permuted_shape), inv)
        return w_mat.reshape(weight_shape)

    def _vmem_limit(self, est_bytes):
        cap = self._vmem_capacity
        return int(min(max(est_bytes + (8 << 20), 32 << 20), cap - (4 << 20)))

    # -- forward --
    def __call__(self, weight):
        if weight.ndim == 1:
            # Launch overhead dominates a length-n normalize: plain XLA.
            x = weight.astype(jnp.float32)
            n = jnp.sqrt(jnp.sum(x * x))
            return (x / jnp.maximum(n, jnp.float32(self.eps))).astype(weight.dtype)

        weight_mat = self._reshape_weight_to_matrix(weight)
        h, w = weight_mat.shape
        w_bytes = h * w * weight_mat.dtype.itemsize

        if w_bytes <= self._min_pallas_bytes:
            w_scaled = self._forward_small_jnp(weight_mat)
        elif 2 * w_bytes + (8 << 20) <= self._resident_budget:
            w_scaled = self._forward_resident(weight_mat, h, w)
        else:
            w_scaled = self._forward_large(weight_mat, h, w)
        return self._unreshape_matrix_to_weight(w_scaled, weight.shape)

    # Tiny weights: whole forward in plain jnp (no Pallas launch).
    def _forward_small_jnp(self, weight_mat):
        wm = weight_mat.astype(jnp.float32)
        u, v = self._u, self._v
        if self.training:
            u, v, _ = _power_iteration_jax(wm, u, v, self.n_power_iterations,
                                           self.eps)
            self._u, self._v = u, v
        sigma = jnp.dot(u, jnp.dot(wm, v))
        scale = jnp.maximum(jnp.float32(1.0), sigma / jnp.float32(self.norm_bound))
        return (wm / scale).astype(weight_mat.dtype)

    # Resident single-read fused kernel with row-tiled output (overlapped
    # rescale + write-back): 1 HBM read of W + 1 write, sigma computed in VMEM.
    def _forward_resident(self, weight_mat, h, w):
        itemsize = weight_mat.dtype.itemsize
        w_bytes = h * w * itemsize

        tile_rows = None
        if self._resident_out_tile_bytes is not None:
            tile_rows = _divisor_row_tile(h, w, itemsize,
                                          self._resident_out_tile_bytes)
        elif w_bytes >= (2 << 20):
            tile_rows = _divisor_row_tile(h, w, itemsize, 1 << 20)
        if tile_rows is None:
            tile_rows = h
        grid = (h // tile_rows,)

        out_tile_bytes = tile_rows * w * itemsize
        # Conservative: whole-W block possibly double-buffered + out tiles +
        # an f32 temp margin + slack.
        est = 2 * w_bytes + 2 * out_tile_bytes + w_bytes + 4 * (h + w) * 4 + (4 << 20)
        compiler_params = pltpu.CompilerParams(
            dimension_semantics=("arbitrary",),        # step 0 carries state
            vmem_limit_bytes=self._vmem_limit(est))

        u_in = self._u.reshape(1, h).astype(jnp.float32)
        v_in = self._v.reshape(1, w).astype(jnp.float32)

        if self.training:
            kernel = functools.partial(
                _sn_resident_train_kernel,
                n_power_iterations=self.n_power_iterations,
                eps=self.eps, norm_bound=self.norm_bound, tile_rows=tile_rows)
            w_scaled, u_new, v_new = pl.pallas_call(
                kernel,
                out_shape=(jax.ShapeDtypeStruct((h, w), weight_mat.dtype),
                           jax.ShapeDtypeStruct((1, h), jnp.float32),
                           jax.ShapeDtypeStruct((1, w), jnp.float32)),
                grid=grid,
                in_specs=[pl.BlockSpec((h, w), lambda i: (0, 0)),
                          pl.BlockSpec((1, h), lambda i: (0, 0)),
                          pl.BlockSpec((1, w), lambda i: (0, 0))],
                out_specs=(pl.BlockSpec((tile_rows, w), lambda i: (i, 0)),
                           pl.BlockSpec((1, h), lambda i: (0, 0)),
                           pl.BlockSpec((1, w), lambda i: (0, 0))),
                scratch_shapes=[pltpu.SMEM((1,), jnp.float32)],
                compiler_params=compiler_params,
            )(weight_mat, u_in, v_in)
            # forward() buffer-update side effect (Python-side, like torch).
            self._u = u_new.reshape(h)
            self._v = v_new.reshape(w)
            return w_scaled

        kernel = functools.partial(_sn_resident_eval_kernel,
                                   norm_bound=self.norm_bound,
                                   tile_rows=tile_rows)
        return pl.pallas_call(
            kernel,
            out_shape=jax.ShapeDtypeStruct((h, w), weight_mat.dtype),
            grid=grid,
            in_specs=[pl.BlockSpec((h, w), lambda i: (0, 0)),
                      pl.BlockSpec((1, h), lambda i: (0, 0)),
                      pl.BlockSpec((1, w), lambda i: (0, 0))],
            out_specs=pl.BlockSpec((tile_rows, w), lambda i: (i, 0)),
            scratch_shapes=[pltpu.SMEM((1,), jnp.float32)],
            compiler_params=compiler_params,
        )(weight_mat, u_in, v_in)

    # Large-W path: streamed power-iteration kernel (training) then a
    # byte-budgeted, "parallel" tiled rescale.
    def _forward_large(self, weight_mat, h, w):
        itemsize = weight_mat.dtype.itemsize
        if self.training:
            tile_rows = _divisor_row_tile(h, w, itemsize, self._stream_tile_bytes)
            stream_ok = False
            if tile_rows is not None:
                est = (2 * tile_rows * w * itemsize + 3 * w * 4
                       + 2 * tile_rows * 4 + (4 << 20))
                stream_ok = est <= max(self._resident_budget, 24 << 20)
            if stream_ok:
                u_new, v_new, sigma = self._stream_power(weight_mat, h, w,
                                                         tile_rows)
            else:
                # TODO(synk): column-tiled streaming power iteration for weights
                # whose flattened width alone exceeds the per-tile VMEM budget.
                u_new, v_new, sigma = _power_iteration_jax(
                    weight_mat, self._u, self._v, self.n_power_iterations,
                    self.eps)
            self._u, self._v = u_new, v_new
        else:
            # TODO(synk): streamed eval-mode sigma kernel; plain JAX costs one
            # extra HBM read of W relative to the fused ideal.
            wv = jnp.dot(weight_mat, self._v.astype(weight_mat.dtype),
                         preferred_element_type=jnp.float32)
            sigma = jnp.dot(self._u, wv)
        return self._scale_tiled(weight_mat, h, w, sigma)

    def _stream_power(self, weight_mat, h, w, tile_rows):
        nr = h // tile_rows
        n_iter = self.n_power_iterations
        itemsize = weight_mat.dtype.itemsize
        est = (2 * tile_rows * w * itemsize + 3 * w * 4
               + 2 * tile_rows * 4 + (4 << 20))
        kernel = functools.partial(_sn_stream_power_kernel, eps=self.eps,
                                   n_iter=n_iter)
        v_in = self._v.reshape(1, w).astype(jnp.float32)
        u_raw, v_new, sigma = pl.pallas_call(
            kernel,
            out_shape=(jax.ShapeDtypeStruct((h, 1), jnp.float32),
                       jax.ShapeDtypeStruct((1, w), jnp.float32),
                       jax.ShapeDtypeStruct((1, 1), jnp.float32)),
            grid=(n_iter, nr),
            in_specs=[pl.BlockSpec((tile_rows, w), lambda it, r: (r, 0)),
                      pl.BlockSpec((1, w), lambda it, r: (0, 0))],
            out_specs=(pl.BlockSpec((tile_rows, 1), lambda it, r: (r, 0)),
                       pl.BlockSpec((1, w), lambda it, r: (0, 0)),
                       pl.BlockSpec((1, 1), lambda it, r: (0, 0))),
            scratch_shapes=[pltpu.VMEM((1, w), jnp.float32),   # current v
                            pltpu.VMEM((1, w), jnp.float32),   # acc = W^T (W v)
                            pltpu.SMEM((1,), jnp.float32)],    # ||W v||^2
            compiler_params=pltpu.CompilerParams(
                dimension_semantics=("arbitrary", "arbitrary"),
                vmem_limit_bytes=self._vmem_limit(est)),
        )(weight_mat, v_in)
        u_raw = u_raw.reshape(h)
        u_new = u_raw / jnp.maximum(jnp.linalg.norm(u_raw),
                                    jnp.float32(self.eps))
        return u_new, v_new.reshape(w), sigma.reshape(())

    def _scale_tiled(self, weight_mat, h, w, sigma):
        scale = jnp.maximum(jnp.float32(1.0),
                            sigma.astype(jnp.float32) / jnp.float32(self.norm_bound))
        inv_scale = (jnp.float32(1.0) / scale).reshape(1)
        itemsize = weight_mat.dtype.itemsize
        tr, tc = _pick_rescale_tile(h, w, itemsize, self._rescale_block_bytes)
        grid = (pl.cdiv(h, tr), pl.cdiv(w, tc))
        est = 4 * tr * tc * itemsize + 2 * tr * tc * 4 + (2 << 20)
        return pl.pallas_call(
            _scale_tile_kernel,
            out_shape=jax.ShapeDtypeStruct((h, w), weight_mat.dtype),
            grid=grid,
            in_specs=[pl.BlockSpec((1,), lambda i, j: (0,),
                                   memory_space=pltpu.MemorySpace.SMEM),
                      pl.BlockSpec((tr, tc), lambda i, j: (i, j))],
            out_specs=pl.BlockSpec((tr, tc), lambda i, j: (i, j)),
            compiler_params=pltpu.CompilerParams(
                dimension_semantics=("parallel", "parallel"),
                vmem_limit_bytes=self._vmem_limit(est)),
        )(inv_scale, weight_mat)


# ----------------------------- plain-JAX reference ---------------------------


def _reference_forward(weight, u, v, n_iter, eps, norm_bound, training=True):
    wm = weight.reshape(weight.shape[0], -1).astype(jnp.float32)
    u = u.astype(jnp.float32)
    v = v.astype(jnp.float32)
    if training:
        for _ in range(n_iter):
            u = wm @ v
            u = u / jnp.maximum(jnp.linalg.norm(u), eps)
            v = wm.T @ u
            v = v / jnp.maximum(jnp.linalg.norm(v), eps)
    sigma = jnp.dot(u, wm @ v)
    scale = jnp.maximum(1.0, sigma / norm_bound)
    return (weight / scale).astype(weight.dtype), u, v


if __name__ == "__main__":
    key = jax.random.PRNGKey(0)
    k_w1, k_w2, k_w3, k_uv1, k_uv2, k_uv3, k_1d = jax.random.split(key, 7)
    eps, nb = 1e-12, 0.95

    # ---- 1) tiny conv weight -> plain-jnp path (launch overhead dominates) ----
    weight1 = jax.random.normal(k_w1, (8, 4, 3, 3), jnp.float32)
    sn1 = SpectralNormPallas(weight1, n_power_iterations=1, dim=0, eps=eps,
                             norm_bound=nb, key=k_uv1)
    ref1, u_r1, v_r1 = _reference_forward(weight1, sn1._u, sn1._v, 1, eps, nb)
    out1 = jax.block_until_ready(sn1(weight1))
    assert out1.shape == weight1.shape and out1.dtype == weight1.dtype
    assert jnp.allclose(out1, ref1, rtol=1e-5, atol=1e-6), "small train mismatch"
    assert jnp.allclose(sn1._u, u_r1, rtol=1e-5, atol=1e-6), "small u mismatch"
    assert jnp.allclose(sn1._v, v_r1, rtol=1e-5, atol=1e-6), "small v mismatch"
    sn1.eval()
    ref1e, _, _ = _reference_forward(weight1, sn1._u, sn1._v, 0, eps, nb,
                                     training=False)
    out1e = jax.block_until_ready(sn1(weight1))
    assert jnp.allclose(out1e, ref1e, rtol=1e-5, atol=1e-6), "small eval mismatch"

    # ---- 2) resident fused kernel with forced row-tiled output (8 tiles) ----
    weight2 = jax.random.normal(k_w2, (64, 8, 4, 4), jnp.float32)  # W_mat (64,128)
    sn2 = SpectralNormPallas(weight2, n_power_iterations=1, dim=0, eps=eps,
                             norm_bound=nb, key=k_uv2,
                             min_pallas_bytes=0, resident_out_tile_bytes=4096)
    ref2, u_r2, v_r2 = _reference_forward(weight2, sn2._u, sn2._v, 1, eps, nb)
    out2 = jax.block_until_ready(sn2(weight2))
    assert jnp.allclose(out2, ref2, rtol=1e-5, atol=1e-6), "resident train mismatch"
    assert jnp.allclose(sn2._u, u_r2, rtol=1e-5, atol=1e-6), "resident u mismatch"
    assert jnp.allclose(sn2._v, v_r2, rtol=1e-5, atol=1e-6), "resident v mismatch"
    sn2.eval()
    ref2e, _, _ = _reference_forward(weight2, sn2._u, sn2._v, 0, eps, nb,
                                     training=False)
    out2e = jax.block_until_ready(sn2(weight2))
    assert jnp.allclose(out2e, ref2e, rtol=1e-5, atol=1e-6), "resident eval mismatch"

    # ---- 3) near-zero weight on the resident path (eps clamps, scale == 1) ----
    weight0 = weight2 * jnp.float32(1e-20)
    sn0 = SpectralNormPallas(weight0, n_power_iterations=1, dim=0, eps=eps,
                             norm_bound=nb, key=k_uv2,
                             min_pallas_bytes=0, resident_out_tile_bytes=4096)
    out0 = jax.block_until_ready(sn0(weight0))
    assert jnp.array_equal(out0, weight0), "near-zero weight should be unscaled"

    # ---- 4) streamed power-iteration + tiled "parallel" rescale (forced) ----
    weight3 = jax.random.normal(k_w3, (64, 8, 4, 4), jnp.float32)
    sn3 = SpectralNormPallas(weight3, n_power_iterations=2, dim=0, eps=eps,
                             norm_bound=nb, key=k_uv3,
                             min_pallas_bytes=0, resident_vmem_budget=0,
                             stream_tile_bytes=4096, rescale_block_bytes=4096)
    ref3, u_r3, v_r3 = _reference_forward(weight3, sn3._u, sn3._v, 2, eps, nb)
    out3 = jax.block_until_ready(sn3(weight3))
    assert jnp.allclose(out3, ref3, rtol=1e-5, atol=1e-6), "streamed train mismatch"
    assert jnp.allclose(sn3._u, u_r3, rtol=1e-5, atol=1e-6), "streamed u mismatch"
    assert jnp.allclose(sn3._v, v_r3, rtol=1e-5, atol=1e-6), "streamed v mismatch"
    sn3.eval()
    ref3e, _, _ = _reference_forward(weight3, sn3._u, sn3._v, 0, eps, nb,
                                     training=False)
    out3e = jax.block_until_ready(sn3(weight3))
    assert jnp.allclose(out3e, ref3e, rtol=1e-5, atol=1e-6), "large eval mismatch"

    # ---- 5) 1-D weight path (plain jnp normalize) ----
    w1d = jax.random.normal(k_1d, (33,), jnp.float32)
    sn4 = SpectralNormPallas(w1d, n_power_iterations=1, dim=0, eps=eps,
                             norm_bound=nb)
    out4 = jax.block_until_ready(sn4(w1d))
    ref4 = w1d / jnp.maximum(jnp.linalg.norm(w1d), eps)
    assert jnp.allclose(out4, ref4, rtol=1e-5, atol=1e-6), "1-D path mismatch"

    print("KERNEL_OK")
</pallas_src>

<mosaic_0001>
module attributes {stable_mosaic.version = 11 : i64} {
  func.func @_sn_resident_train_kernel(%arg0: i32, %arg1: memref<64x128xf32, #tpu.memory_space<vmem>>, %arg2: memref<1x64xf32, #tpu.memory_space<vmem>>, %arg3: memref<1x128xf32, #tpu.memory_space<vmem>>, %arg4: memref<8x128xf32, #tpu.memory_space<vmem>>, %arg5: memref<1x64xf32, #tpu.memory_space<vmem>>, %arg6: memref<1x128xf32, #tpu.memory_space<vmem>>, %arg7: memref<1xf32, #tpu.memory_space<smem>>) attributes {dimension_semantics = [#tpu.dimension_semantics<arbitrary>], iteration_bounds = array<i64: 8>, scalar_prefetch = 0 : i64, scratch_operands = 1 : i64, tpu.core_type = #tpu.core_type<tc>, window_params = [{pipeline_mode = #tpu.pipeline_mode<synchronous>, transform_indices = @transform_0, window_bounds = array<i64: 64, 128>}, {pipeline_mode = #tpu.pipeline_mode<synchronous>, transform_indices = @transform_1, window_bounds = array<i64: 1, 64>}, {pipeline_mode = #tpu.pipeline_mode<synchronous>, transform_indices = @transform_2, window_bounds = array<i64: 1, 128>}, {transform_indices = @transform_3, window_bounds = array<i64: 8, 128>}, {pipeline_mode = #tpu.pipeline_mode<synchronous>, transform_indices = @transform_4, window_bounds = array<i64: 1, 64>}, {pipeline_mode = #tpu.pipeline_mode<synchronous>, transform_indices = @transform_5, window_bounds = array<i64: 1, 128>}]} {
    %c0_i32 = arith.constant 0 : i32
    %0 = arith.cmpi eq, %arg0, %c0_i32 : i32
    %1 = arith.extui %0 : i1 to i32
    %c0_i32_0 = arith.constant 0 : i32
    %2 = arith.cmpi ne, %1, %c0_i32_0 : i32
    scf.if %2 {
      %c0_4 = arith.constant 0 : index
      %c0_5 = arith.constant 0 : index
      %11 = vector.load %arg1[%c0_4, %c0_5] : memref<64x128xf32, #tpu.memory_space<vmem>>, vector<64x128xf32>
      %c0_6 = arith.constant 0 : index
      %c0_7 = arith.constant 0 : index
      %12 = vector.load %arg3[%c0_6, %c0_7] : memref<1x128xf32, #tpu.memory_space<vmem>>, vector<1x128xf32>
      %cst = arith.constant dense<0.000000e+00> : vector<64x1xf32>
      %13 = tpu.matmul %11, %12, %cst {dimension_numbers = #tpu.dot_dimension_numbers<[1], [1], [0], [0], [0, 0, 1, 0], [], []>} : vector<64x128xf32>, vector<1x128xf32>, vector<64x1xf32> -> vector<64x1xf32>
      %14 = tpu.transpose %13, [1, 0] : vector<64x1xf32> -> vector<1x64xf32>
      %15 = arith.mulf %14, %14 : vector<1x64xf32>
      %16 = vector.shape_cast %15 : vector<1x64xf32> to vector<1x1x64xf32>
      %cst_8 = arith.constant dense<0.000000e+00> : vector<1xf32>
      %17 = vector.multi_reduction <add>, %16, %cst_8 [1, 2] : vector<1x1x64xf32> to vector<1xf32>
      %18 = vector.shape_cast %17 : vector<1xf32> to vector<1x1x1xf32>
      %19 = vector.extract %18[0, 0, 0] : f32 from vector<1x1x1xf32>
      %20 = math.sqrt %19 : f32
      %cst_9 = arith.constant 9.99999996E-13 : f32
      %21 = arith.maximumf %20, %cst_9 : f32
      %22 = vector.broadcast %21 : f32 to vector<1x64xf32>
      %23 = arith.divf %14, %22 : vector<1x64xf32>
      %cst_10 = arith.constant dense<0.000000e+00> : vector<1x128xf32>
      %24 = tpu.matmul %23, %11, %cst_10 {dimension_numbers = #tpu.dot_dimension_numbers<[1], [0], [0], [1], [0, 0, 1, 1], [], []>} : vector<1x64xf32>, vector<64x128xf32>, vector<1x128xf32> -> vector<1x128xf32>
      %25 = arith.mulf %24, %24 : vector<1x128xf32>
      %26 = vector.shape_cast %25 : vector<1x128xf32> to vector<1x1x128xf32>
      %cst_11 = arith.constant dense<0.000000e+00> : vector<1xf32>
      %27 = vector.multi_reduction <add>, %26, %cst_11 [1, 2] : vector<1x1x128xf32> to vector<1xf32>
      %28 = vector.shape_cast %27 : vector<1xf32> to vector<1x1x1xf32>
      %29 = vector.extract %28[0, 0, 0] : f32 from vector<1x1x1xf32>
      %30 = math.sqrt %29 : f32
      %cst_12 = arith.constant 9.99999996E-13 : f32
      %31 = arith.maximumf %30, %cst_12 : f32
      %32 = vector.broadcast %31 : f32 to vector<1x128xf32>
      %33 = arith.divf %24, %32 : vector<1x128xf32>
      %cst_13 = arith.constant 0.949999988 : f32
      %34 = arith.divf %30, %cst_13 : f32
      %cst_14 = arith.constant 1.000000e+00 : f32
      %35 = arith.maximumf %cst_14, %34 : f32
      %cst_15 = arith.constant 1.000000e+00 : f32
      %36 = arith.divf %cst_15, %35 : f32
      %c0_16 = arith.constant 0 : index
      %37 = memref.load %arg7[%c0_16] : memref<1xf32, #tpu.memory_space<smem>>
      memref.store %36, %arg7[%c0_16] : memref<1xf32, #tpu.memory_space<smem>>
      %c0_17 = arith.constant 0 : index
      %c0_18 = arith.constant 0 : index
      %38 = vector.load %arg5[%c0_17, %c0_18] : memref<1x64xf32, #tpu.memory_space<vmem>>, vector<1x64xf32>
      tpu.vector_store %arg5[%c0_17, %c0_18], %23 {strides = array<i32>} : memref<1x64xf32, #tpu.memory_space<vmem>>, vector<1x64xf32>,
      %c0_19 = arith.constant 0 : index
      %c0_20 = arith.constant 0 : index
      %39 = vector.load %arg6[%c0_19, %c0_20] : memref<1x128xf32, #tpu.memory_space<vmem>>, vector<1x128xf32>
      tpu.vector_store %arg6[%c0_19, %c0_20], %33 {strides = array<i32>} : memref<1x128xf32, #tpu.memory_space<vmem>>, vector<1x128xf32>,
    } else {
    }
    %c8_i32 = arith.constant 8 : i32
    %3 = arith.muli %arg0, %c8_i32 : i32
    %4 = tpu.assume_multiple %3, 8 : i32
    %5 = arith.index_cast %4 : i32 to index
    %c0 = arith.constant 0 : index
    %6 = vector.load %arg1[%5, %c0] : memref<64x128xf32, #tpu.memory_space<vmem>>, vector<8x128xf32>
    %c0_1 = arith.constant 0 : index
    %7 = memref.load %arg7[%c0_1] : memref<1xf32, #tpu.memory_space<smem>>
    %8 = vector.broadcast %7 : f32 to vector<8x128xf32>
    %9 = arith.mulf %6, %8 : vector<8x128xf32>
    %c0_2 = arith.constant 0 : index
    %c0_3 = arith.constant 0 : index
    %10 = vector.load %arg4[%c0_2, %c0_3] : memref<8x128xf32, #tpu.memory_space<vmem>>, vector<8x128xf32>
    tpu.vector_store %arg4[%c0_2, %c0_3], %9 {strides = array<i32>} : memref<8x128xf32, #tpu.memory_space<vmem>>, vector<8x128xf32>,
    return
  }
  func.func @transform_0(%arg0: i32) -> (i32, i32) {
    %c0_i32 = arith.constant 0 : i32
    %c0_i32_0 = arith.constant 0 : i32
    %c0_i32_1 = arith.constant 0 : i32
    return %c0_i32, %c0_i32_0 : i32, i32
  }
  func.func @transform_1(%arg0: i32) -> (i32, i32) {
    %c0_i32 = arith.constant 0 : i32
    %c0_i32_0 = arith.constant 0 : i32
    %c0_i32_1 = arith.constant 0 : i32
    return %c0_i32, %c0_i32_0 : i32, i32
  }
  func.func @transform_2(%arg0: i32) -> (i32, i32) {
    %c0_i32 = arith.constant 0 : i32
    %c0_i32_0 = arith.constant 0 : i32
    %c0_i32_1 = arith.constant 0 : i32
    return %c0_i32, %c0_i32_0 : i32, i32
  }
  func.func @transform_3(%arg0: i32) -> (i32, i32) {
    %c0_i32 = arith.constant 0 : i32
    %c0_i32_0 = arith.constant 0 : i32
    return %arg0, %c0_i32 : i32, i32
  }
  func.func @transform_4(%arg0: i32) -> (i32, i32) {
    %c0_i32 = arith.constant 0 : i32
    %c0_i32_0 = arith.constant 0 : i32
    %c0_i32_1 = arith.constant 0 : i32
    return %c0_i32, %c0_i32_0 : i32, i32
  }
  func.func @transform_5(%arg0: i32) -> (i32, i32) {
    %c0_i32 = arith.constant 0 : i32
    %c0_i32_0 = arith.constant 0 : i32
    %c0_i32_1 = arith.constant 0 : i32
    return %c0_i32, %c0_i32_0 : i32, i32
  }
}

</mosaic_0001>

<bundles_post_ra>
// kernel: tpu_custom_call.1
= control target key start
LH: loop header
LB: loop body
LE: loop exit
PB: predicated region body
PF: predicated region fallthrough
CT: control target
= control target key end

     0   :  { %11 = vsyncpa [#allocation4], 0  ;;  %s1085_s0 = inlined_call_operand.hbm [shape: f32[64,128], index: 0, kind: input, shape index: {}]   ;;  %s1086_s1 = inlined_call_operand.vmem [shape: f32[1,64], index: 1, kind: input, shape index: {}]   ;;  %s1087_s2 = inlined_call_operand.vmem [shape: f32[1,128], index: 2, kind: input, shape index: {}]   ;;  %s1088_s3 = inlined_call_operand.hbm [shape: f32[64,128], index: 3, kind: output, shape index: {0}]   ;;  %s1089_s4 = inlined_call_operand.hbm [shape: f32[1,64], index: 4, kind: output, shape index: {1}]   ;;  %s1090_s5 = inlined_call_operand.hbm [shape: f32[1,128], index: 5, kind: output, shape index: {2}]  }
   0x1   :  { %12 = vsyncpa [#allocation5], 0 }
   0x2   :  { %14 = vsyncpa [#allocation5 + $0x1], 0 }
   0x3   :  { %15 = vsyncpa [#allocation8], 0  ;;  %s891_s18 = smov 0   ;;  %s893_s19 = smov 0  }
   0x4   :  { %s895_s1 = smov 0   ;;  %s897_s20 = smov 0  }
   0x5 LB: > { %s912_s21 = sadd.s32 4294967295, %s848_s20   ;;  %s549_s22 = sadd.s32 4294967294, %s848_s20   ;;  %s848_s20 = sphi %s897_s20, %s1116_s20   ;;  %s844_s1 = sphi %s895_s1, %s1115_s1   ;;  %s840_s19 = sphi %s893_s19, %s1114_s19   ;;  %s836_s18 = sphi %s891_s18, %s1113_s18  }
   0x6   : > { %s916_s23 = sadd.s32 1, %s848_s20   ;;  %s91_s24 = sadd.s32 1, %s844_s1 }
   0x7   : > { %s88_s25 = ssub.s32 %s848_s20, %s916_s23  ;;  %p101_p0 = scmp.ne.s32.totalorder %s844_s1, %s840_s19 }
   0x8   : > { %p89_p1 = scmp.eq.s32.totalorder %s88_s25, 0  ;;  %p1091_p2 = scmp.eq.s32.totalorder %s912_s21, 7 }
   0x9   : > { %p107_p3 = scmp.ne.s32.totalorder %s840_s19, %s836_s18  ;;  %p108_p4 = scmp.eq.s32.totalorder %s549_s22, 7 }
   0xa   : > { %s927_s26 = scalar_select %p89_p1, %s844_s1, %s91_s24  }
   0xb   : > { %p931_p5 = por %p1091_p2, %p101_p0  ;;  %p935_p6 = por %p108_p4, %p107_p3 }
   0xc   : > { %p550_p7 = scmp.ge.s32.totalorder %s848_s20, 1  ;;  %p157_p8 = scmp.lt.s32.totalorder %s848_s20, 9 }
   0xd   : > { %s1095_s27 = scalar_select %p931_p5, 1, 0 }
   0xe   : > { %s1096_s28 = scalar_select %p935_p6, 1, 0 }
   0xf   : > { %p1092_p10 = scmp.eq.s32.totalorder %s912_s21, 0  ;;  %p943_p11 = pnand %p550_p7, %p157_p8 }
  0x10   : > { %s850_s30 = smov [#allocation3]   ;;  %s698_s10 = scalar_lea.hbm %s1085_s0, 1024 }
  0x11   : > { %s1097_s29 = scalar_select %p943_p11, 1, 0 }
  0x12   : > { %s169_s6 = sshll.u32 %s850_s30, 4  ;;  %p631_p12 = pneg %p943_p11  ;;  %s170_s6 = int_to_ptr.vmem [resolvable:$true] %s169_s6 }
  0x13   : > { %p699_p0 = scmp.ne.s32.totalorder %s1085_s0, %s698_s10  ;;  %p705_p7 = scmp.lt.u32.totalorder %s698_s10, %s1085_s0 }
  0x14   : > { %p951_p13 = pnand %p1092_p10, %p631_p12 }
  0x16   : > { %p700_p1 = pneg %p951_p13 }
  0x18   : > { %p701_p3 = pnand %p700_p1, %p699_p0 }
  0x1a   : > { %p702_p4 = pneg %p701_p3 }
  0x1c   : > { %p707_p8 = pnand %p705_p7, %p702_p4 }
  0x1e   : > { %710 = shalt.err (!%p707_p8)
}
  0x1f   : > { %s711_s15 = scalar_lea.vmem %s170_s6, 1024  ;;  %p719_p10 = scmp.lt.s32.totalorder %s170_s6, %s170_s6 }
  0x20   : > { %p712_p12 = scmp.ne.s32.totalorder %s170_s6, %s711_s15  ;;  %p720_p6 = scmp.lt.s32.totalorder %s711_s15, %s711_s15 }
  0x22   : > { %p714_p2 = pnand %p712_p12, %p700_p1  ;;  %p721_p5 = por %p720_p6, %p719_p10 }
  0x24   : > { %p715_p9 = pneg %p714_p2 }
  0x26   : > { %p722_p11 = pnand %p721_p5, %p715_p9 }
  0x28   : > { %725 = shalt.err (!%p722_p11)
}
  0x29   : > { %s851_s16 = smov 128   ;;  %s852_s17 = smov 8  }
  0x2a   : > { %634 = dma.hbm_to_vmem [thread:$0]  (!%p951_p13), %s1085_s0, 1024, %s170_s6, [#allocation4], %s851_s16, %s851_s16, %s852_s17  }
  0x2b   : > { %p1099_p0 = scmp.ne.s32.totalorder %s1097_s29, 0 }
  0x2c   : > { %p1100_p3 = scmp.eq.s32.totalorder (!%p1099_p0), %s912_s21, 0 }
  0x2d   : > { %191 = sbr.rel (%p1099_p0) target bundleno = 1245 (0x4dd), region = 32 }
  0x34   : > { %823 = dma.done.wait (%p1100_p3), [#allocation4], 1024   ;;  %p1101_p2 = pmov %p1100_p3 }
  0x35   : > { %s207_s25 = sand.u32 1, %s840_s19   ;;  %p1102_p5 = scmp.ne.s32.totalorder %s912_s21, 0 }
  0x36   : > { %825 = vsyncadd (%p1101_p2), [#allocation4], 4294966272  ;;  %s980_s30 = sshll.u32 %s207_s25, 3  ;;  %v218_v0 = vld [vmem:[#allocation3] sm:$0xff] (!%p1102_p5)  ;;  %v219_v2 = vld [vmem:[#allocation3 + $0x8] sm:$0xff] (!%p1102_p5)  ;;  %vm290_vm0 = vcmask (!%p1102_p5), 516096  }
  0x37   : > { %s209_s7 = scalar_lea.vmem [#allocation6], %s980_s30  ;;  %217 = sbr.rel (%p1102_p5) target bundleno = 1168 (0x490), region = 40  ;;  %v556_v1 = vld [vmem:[%s1087_s2] ss:$0 sm:$0xff] (!%p1102_p5)  ;;  %v220_v4 = vld [vmem:[#allocation3 + $0x10] sm:$0xff] (!%p1102_p5)  ;;  %v221_v5 = vld [vmem:[#allocation3 + $0x18] sm:$0xff] (!%p1102_p5)  ;;  %v596_v31 = vpack.c.bf16 (!%p1102_p5), %v219_v2, %v218_v0 }
  0x38   : > { %v233_v3 = vmul.f32 (!%p1102_p5), %v556_v1, %v218_v0  ;;  %v235_v6 = vmul.f32 (!%p1102_p5), %v556_v1, %v220_v4  ;;  %v599_v7 = vpack.c.bf16 (!%p1102_p5), %v221_v5, %v220_v4  ;;  %v222_v8 = vld [vmem:[#allocation3 + $0x20] sm:$0xff] (!%p1102_p5)  ;;  %v223_v9 = vld [vmem:[#allocation3 + $0x28] sm:$0xff] (!%p1102_p5)  ;;  %v234_v10 = vmul.f32 (!%p1102_p5), %v556_v1, %v219_v2  ;;  %v224_v12 = vld [vmem:[#allocation3 + $0x30] sm:$0xff] (!%p1102_p5)  ;;  %s856_s10 = smov (!%p1102_p5), 1e-12   ;;  %s857_s16 = smov (!%p1102_p5), 1.0  }
  0x39   : > { %v602_v11 = vpack.c.bf16 (!%p1102_p5), %v223_v9, %v222_v8  ;;  %v225_v13 = vld [vmem:[#allocation3 + $0x38] sm:$0xff] (!%p1102_p5)  ;;  %v236_v14 = vmul.f32 (!%p1102_p5), %v556_v1, %v221_v5  ;;  %v237_v16 = vmul.f32 (!%p1102_p5), %v556_v1, %v222_v8  ;;  %v238_v17 = vmul.f32 (!%p1102_p5), %v556_v1, %v223_v9 }
  0x3a   : > { %241 = vadd.xlane.f32.xlu0 (!%p1102_p5), %v233_v3  ;;  %245 = vadd.xlane.f32.xlu1 (!%p1102_p5), %v235_v6  ;;  %v605_v15 = vpack.c.bf16 (!%p1102_p5), %v225_v13, %v224_v12  ;;  %v239_v18 = vmul.f32 (!%p1102_p5), %v556_v1, %v224_v12  ;;  %v240_v19 = vmul.f32 (!%p1102_p5), %v556_v1, %v225_v13  ;;  %v853_v33 = vmov (!%p1102_p5), 0.0|0.0  }
  0x3b   : > { %595 = vmatprep.subr.bf16.mxu0 (!%p1102_p5), %v853_v33  ;;  %vm854_vm1 = vmmov (!%p1102_p5), 0   ;;  %v855_v36 = vmov (!%p1102_p5), 0.0   ;;  %vm314_vm4 = vcmask (!%p1102_p5), 523264   ;;  %vm389_vm5 = vcmask (!%p1102_p5), 1040384  }
  0x3c   : > { %597 = vmatpush3.bf16.msra.mxu0 (!%p1102_p5), %v596_v31  ;;  %592 = vmatprep.mubr.msk.f32.mxu0 (!%p1102_p5), %vm854_vm1, %v855_v36 }
  0x3d   : > { %598 = vmatprep.subr.bf16.mxu0 (!%p1102_p5), %v853_v33 }
  0x3e   : > { %243 = vadd.xlane.f32.xlu0 %v234_v10  ;;  %247 = vadd.xlane.f32.xlu1 %v236_v14 }
  0x40   : > { %600 = vmatpush3.bf16.msra.mxu0 %v599_v7 }
  0x41   : > { %601 = vmatprep.subr.bf16.mxu0 %v853_v33 }
  0x42   : > { %249 = vadd.xlane.f32.xlu0 %v237_v16  ;;  %251 = vadd.xlane.f32.xlu1 %v238_v17 }
  0x44   : > { %603 = vmatpush3.bf16.msra.mxu0 %v602_v11 }
  0x45   : > { %604 = vmatprep.subr.bf16.mxu0 %v853_v33 }
  0x46   : > { %253 = vadd.xlane.f32.xlu0 %v239_v18  ;;  %255 = vadd.xlane.f32.xlu1 %v240_v19 }
  0x48   : > { %606 = vmatpush3.bf16.msra.mxu0 %v605_v15 }
  0xc7   : > { %v242_v20 = vpop.xlane.xlu0 %241  ;;  %v246_v22 = vpop.xlane.xlu1 %245 }
  0xc8   : > { %257 = vxpose.xlu0.b32.start [1/8] (short) (narrow) %v242_v20, 8 }
  0xcb   : > { %v244_v21 = vpop.xlane.xlu0 %243  ;;  %v248_v23 = vpop.xlane.xlu1 %247 }
  0xcc   : > { %258 = vxpose.xlu0.b32.cont [2/8] (short) (narrow) %v244_v21, 8 }
  0xcf   : > { %v250_v24 = vpop.xlane.xlu0 %249  ;;  %v252_v25 = vpop.xlane.xlu1 %251 }
  0xd0   : > { %259 = vxpose.xlu0.b32.cont [3/8] (short) (narrow) %v246_v22, 8 }
  0xd3   : > { %v254_v26 = vpop.xlane.xlu0 %253  ;;  %v256_v27 = vpop.xlane.xlu1 %255 }
  0xd4   : > { %260 = vxpose.xlu0.b32.cont [4/8] (short) (narrow) %v248_v23, 8 }
  0xd8   : > { %261 = vxpose.xlu0.b32.cont [5/8] (short) (narrow) %v250_v24, 8 }
  0xdc   : > { %262 = vxpose.xlu0.b32.cont [6/8] (short) (narrow) %v252_v25, 8 }
  0xe0   : > { %263 = vxpose.xlu0.b32.cont [7/8] (short) (narrow) %v254_v26, 8 }
  0xe4   : > { %264 = vxpose.xlu0.b32.end [8/8] (short) (narrow) %v256_v27, 8 }
 0x148   : > { %v273_v28 = vpop.trf.xlu0 }
 0x149   : > { %v289_v29 = vmul.f32 %v273_v28, %v273_v28 }
 0x14b   : > { %v291_v30 = vsel %vm290_vm0, %v289_v29, 0.0 }
 0x14c   : > { %292 = vadd.xlane.f32.xlu1 %v291_v30 }
 0x1d9   : > { %v293_v32 = vpop.xlane.xlu1 %292 }
 0x1da   : > { %v294_v34 = vrot.slane %v293_v32, 4 }
 0x1dc   : > { %v295_v35 = vadd.f32 %v294_v34, %v293_v32 }
 0x1de   : > { %v296_v37 = vrot.slane %v295_v35, 2 }
 0x1e0   : > { %v297_v38 = vadd.f32 %v296_v37, %v295_v35 }
 0x1e2   : > { %v298_v39 = vrot.slane %v297_v38, 1 }
 0x1e4   : > { %v299_v40 = vadd.f32 %v298_v39, %v297_v38 }
 0x1e6   : > { %607 = vpush %v299_v40 }
 0x217   : > { %s608_s8 = spop %607 }
 0x218   : > { %v301_v41 = vstv %s608_s8 }
 0x219   : > { %688 = vrsqrt.f32 %v301_v41  ;;  %vm304_vm2 = vcmp.eq.f32.partialorder %v301_v41, inf  ;;  %v307_v44 = vand.u32 2147483648, %v301_v41  ;;  %vm306_vm3 = vcmp.eq.f32.partialorder %v301_v41, 0.0 }
 0x223   : > { %v689_v42 = vpop.eup %688 }
 0x224   : > { %v303_v43 = vmul.f32 %v689_v42, %v301_v41 }
 0x226   : > { %v305_v45 = vsel %vm304_vm2, %v301_v41, %v303_v43 }
 0x227   : > { %v308_v46 = vsel %vm306_vm3, %v307_v44, %v305_v45 }
 0x228   : > { %609 = vpush %v308_v46 }
 0x259   : > { %s610_s9 = spop %609 }
 0x25a   : > { %s310_s11 = smax.f32 %s856_s10, %s610_s9 }
 0x25b   : > { %v311_v47 = vstv %s310_s11 }
 0x25c   : > { %690 = vrcp.f32 %v311_v47 }
 0x266   : > { %v691_v48 = vpop.eup %690 }
 0x267   : > { %v313_v49 = vmul.f32 %v691_v48, %v273_v28 }
 0x269   : > { %593 = vmatmul.mubr.msk.f32.vlgmr.msra.gmra.mrb[0].mxu0 %vm314_vm4, %v313_v49  ;;  %422 = vst.msk [vmem:[#allocation7] sm:$0x1] %vm290_vm0, %v313_v49 }
 0x33c   : > { %v384_v50 = vpop.f32.mrb[0].mxu0 }
 0x33d   : > { %v388_v51 = vmul.f32 %v384_v50, %v384_v50  ;;  %v594_v52 = vpop.f32.mrb[1].mxu0 }
 0x33f   : > { %v390_v53 = vsel %vm389_vm5, %v388_v51, 0.0 }
 0x340   : > { %391 = vadd.xlane.f32.xlu1 %v390_v53 }
 0x3cd   : > { %v392_v54 = vpop.xlane.xlu1 %391 }
 0x3ce   : > { %v393_v55 = vrot.slane %v392_v54, 4 }
 0x3d0   : > { %v394_v56 = vadd.f32 %v393_v55, %v392_v54 }
 0x3d2   : > { %v395_v57 = vrot.slane %v394_v56, 2 }
 0x3d4   : > { %v396_v58 = vadd.f32 %v395_v57, %v394_v56 }
 0x3d6   : > { %v397_v59 = vrot.slane %v396_v58, 1 }
 0x3d8   : > { %v398_v60 = vadd.f32 %v397_v59, %v396_v58 }
 0x3da   : > { %611 = vpush %v398_v60 }
 0x40b   : > { %s612_s12 = spop %611 }
 0x40c   : > { %v400_v61 = vstv %s612_s12 }
 0x40d   : > { %692 = vrsqrt.f32 %v400_v61  ;;  %vm403_vm6 = vcmp.eq.f32.partialorder %v400_v61, inf  ;;  %v406_v0 = vand.u32 2147483648, %v400_v61  ;;  %vm405_vm7 = vcmp.eq.f32.partialorder %v400_v61, 0.0 }
 0x417   : > { %v693_v62 = vpop.eup %692 }
 0x418   : > { %v402_v63 = vmul.f32 %v693_v62, %v400_v61 }
 0x41a   : > { %v404_v1 = vsel %vm403_vm6, %v400_v61, %v402_v63 }
 0x41b   : > { %v407_v2 = vsel %vm405_vm7, %v406_v0, %v404_v1 }
 0x41c   : > { %613 = vpush %v407_v2 }
 0x44d   : > { %s614_s13 = spop %613 }
 0x44e   : > { %s409_s14 = smax.f32 %s856_s10, %s614_s13  ;;  %s415_s15 = smul.f32 1.0526316, %s614_s13 }
 0x44f   : > { %v410_v3 = vstv %s409_s14 }
 0x450   : > { %694 = vrcp.f32 %v410_v3  ;;  %s416_s17 = smax.f32 %s857_s16, %s415_s15 }
 0x451   : > { %v417_v4 = vstv %s416_s17 }
 0x452   : > { %696 = vrcp.f32 %v417_v4 }
 0x45a   : > { %v695_v5 = vpop.eup %694 }
 0x45b   : > { %v412_v6 = vmul.f32 %v695_v5, %v384_v50 }
 0x45c   : > { %v697_v7 = vpop.eup %696 }
 0x45d   : > { %423 = vst [vmem:[#allocation9] sm:$0x1] %v412_v6  ;;  %615 = vpush %v697_v7 }
 0x48e   : > { %s616_s22 = spop %615 }
 0x48f   : > { %421 = sst [smem:[#allocation2]] %s616_s22 }
 0x490 PF: > { %s558_s24 = sshll.u32 %s912_s21, 3  ;;  %s427_s29 = sld [smem:[#allocation2]] }
 0x491   : > { %s858_s6 = smov [#allocation7]   ;;  %s560_s9 = sshll.u32 %s912_s21, 7 }
 0x492   : > { %s456_s8 = sshll.u32 %s858_s6, 4  ;;  %s425_s10 = scalar_lea.vmem [#allocation3], %s558_s24  ;;  %s457_s8 = int_to_ptr.vmem [resolvable:$true] %s456_s8 }
 0x493   : > { %v426_v8 = vld [vmem:[%s425_s10] sm:$0xff]  ;;  %s997_s13 = scalar_lea.hbm %s1088_s3, %s560_s9  ;;  %s726_s14 = scalar_lea.vmem %s457_s8, 16 }
 0x494   : > { %p727_p6 = scmp.ne.s32.totalorder %s457_s8, %s726_s14  ;;  %p1103_p9 = scmp.eq.s32.totalorder %s912_s21, 7 }
 0x495   : > { %s732_s15 = scalar_lea.vmem %s457_s8, 32  ;;  %p733_p13 = scmp.lt.s32.totalorder %s457_s8, %s457_s8 }
 0x496   : > { %p728_p10 = pnand %p727_p6, %p1103_p9  ;;  %p734_p1 = scmp.lt.s32.totalorder %s732_s15, %s726_s14 }
 0x498   : > { %p729_p11 = pneg %p728_p10  ;;  %p735_p4 = por %p734_p1, %p733_p13 }
 0x49a   : > { %p736_p7 = pnand %p735_p4, %p729_p11 }
 0x49c   : > { %739 = shalt.err (!%p736_p7)
}
 0x49d   : > { %s740_s22 = scalar_lea.hbm %s1089_s4, 16  ;;  %p1104_p12 = pmov %p1103_p9 }
 0x49e   : > { %p741_p8 = scmp.ne.s32.totalorder %s1089_s4, %s740_s22  ;;  %p746_p2 = scmp.lt.u32.totalorder %s740_s22, %s1089_s4 }
 0x4a0   : > { %p742_p0 = pnand %p741_p8, %p1104_p12 }
 0x4a2   : > { %p743_p3 = pneg %p742_p0 }
 0x4a4   : > { %p748_p5 = pnand %p746_p2, %p743_p3 }
 0x4a6   : > { %751 = shalt.err (!%p748_p5)
}
 0x4a7   : > { %p1105_p6 = pmov %p1103_p9  ;;  %v428_v9 = vstv %s427_s29  ;;  %s445_s14 = sshll.u32 %s209_s7, 4  ;;  %s1019_s14 = int_to_ptr.vmem [resolvable:$true] %s445_s14 }
 0x4a8   : > { %v429_v10 = vmul.f32 %v428_v9, %v426_v8  ;;  %s859_s15 = smov [#allocation9]  }
 0x4a9   : > { %623 = dma.vmem_to_hbm [thread:$0]  (%p1105_p6), %s457_s8, 16, %s1089_s4, [#allocation8]  }
 0x4aa   : > { %s467_s16 = sshll.u32 %s859_s15, 4  ;;  %430 = vst [vmem:[%s209_s7] sm:$0xff] %v429_v10  ;;  %p1106_p10 = pmov %p1105_p6  ;;  %s468_s16 = int_to_ptr.vmem [resolvable:$true] %s467_s16 }
 0x4ab   : > { %s752_s17 = scalar_lea.vmem %s468_s16, 16  ;;  %s758_s22 = scalar_lea.vmem %s468_s16, 32 }
 0x4ac   : > { %p753_p9 = scmp.ne.s32.totalorder %s468_s16, %s752_s17  ;;  %p759_p1 = scmp.lt.s32.totalorder %s468_s16, %s468_s16 }
 0x4ad   : > { %p760_p4 = scmp.lt.s32.totalorder %s758_s22, %s752_s17 }
 0x4ae   : > { %p754_p11 = pnand %p753_p9, %p1106_p10 }
 0x4af   : > { %p761_p7 = por %p760_p4, %p759_p1 }
 0x4b0   : > { %p755_p13 = pneg %p754_p11 }
 0x4b2   : > { %p762_p8 = pnand %p761_p7, %p755_p13 }
 0x4b4   : > { %765 = shalt.err (!%p762_p8)
}
 0x4b5   : > { %s766_s24 = scalar_lea.hbm %s1090_s5, 16  ;;  %p1107_p0 = pmov %p1105_p6 }
 0x4b6   : > { %p767_p12 = scmp.ne.s32.totalorder %s1090_s5, %s766_s24  ;;  %p772_p5 = scmp.lt.u32.totalorder %s766_s24, %s1090_s5 }
 0x4b8   : > { %p768_p3 = pnand %p767_p12, %p1107_p0 }
 0x4ba   : > { %p769_p2 = pneg %p768_p3 }
 0x4bc   : > { %p774_p6 = pnand %p772_p5, %p769_p2 }
 0x4be   : > { %777 = shalt.err (!%p774_p6)
}
 0x4bf   : > { %p1108_p9 = pmov %p1107_p0  ;;  %s432_s12 = scalar_lea.sflag [#allocation5], %s207_s25 }
 0x4c0   : > { %s778_s15 = scalar_lea.vmem %s1019_s14, 128  ;;  %p1109_p11 = scmp.ne.s32.totalorder %s1095_s27, 0 }
 0x4c1   : > { %625 = dma.vmem_to_hbm [thread:$0]  (%p1108_p9), %s468_s16, 16, %s1090_s5, [#allocation8]  }
 0x4c2   : > { %p779_p10 = scmp.ne.s32.totalorder %s1019_s14, %s778_s15  ;;  %s860_s17 = smov [#allocation6]  }
 0x4c3   : > { %s782_s22 = sshll.u32 %s860_s17, 4  ;;  %s783_s22 = int_to_ptr.vmem [resolvable:$false] %s782_s22 }
 0x4c4   : > { %p780_p13 = pnand %p779_p10, %p1109_p11  ;;  %s784_s29 = scalar_lea.vmem %s783_s22, 256 }
 0x4c5   : > { %p785_p4 = scmp.lt.s32.totalorder %s1019_s14, %s783_s22  ;;  %p786_p7 = scmp.lt.s32.totalorder %s784_s29, %s778_s15 }
 0x4c6   : > { %p781_p1 = pneg %p780_p13 }
 0x4c7   : > { %p787_p8 = por %p786_p7, %p785_p4 }
 0x4c9   : > { %p788_p12 = pnand %p787_p8, %p781_p1 }
 0x4cb   : > { %791 = shalt.err (!%p788_p12)
}
 0x4cc   : > { %s792_s25 = scalar_lea.hbm %s997_s13, 128  ;;  %s796_s24 = scalar_lea.hbm %s1088_s3, 1024 }
 0x4cd   : > { %p793_p0 = scmp.ne.s32.totalorder %s997_s13, %s792_s25  ;;  %p797_p5 = scmp.lt.u32.totalorder %s997_s13, %s1088_s3 }
 0x4ce   : > { %p798_p6 = scmp.lt.u32.totalorder %s796_s24, %s792_s25  ;;  %p800_p10 = scmp.lt.u32.totalorder %s792_s25, %s997_s13 }
 0x4cf   : > { %p794_p3 = pnand %p793_p0, %p1109_p11 }
 0x4d0   : > { %p799_p9 = por %p798_p6, %p797_p5 }
 0x4d1   : > { %p795_p2 = pneg %p794_p3 }
 0x4d2   : > { %p801_p13 = por %p800_p10, %p799_p9 }
 0x4d4   : > { %p802_p1 = pnand %p801_p13, %p795_p2 }
 0x4d6   : > { %805 = shalt.err (!%p802_p1)
}
 0x4d7   : > { %621 = dma.vmem_to_hbm [thread:$0]  (%p1109_p11), %s1019_s14, 128, %s997_s13, %s432_s12  }
 0x4d8   : > { %p1110_p4 = scmp.eq.s32.totalorder %s912_s21, 7 }
 0x4da   : > { %827 = dma.done.wait (%p1110_p4), [#allocation8], 32   ;;  %p1111_p7 = pmov %p1110_p4 }
 0x4dc   : > { %829 = vsyncadd (%p1111_p7), [#allocation8], 4294967264 }
 0x4dd PF: > { %p645_p8 = scmp.ge.s32.totalorder %s848_s20, 2  ;;  %s487_s30 = sand.u32 1, %s836_s18  }
 0x4de   : > { %p1112_p12 = scmp.ne.s32.totalorder %s1096_s28, 0  ;;  %s488_s7 = scalar_lea.sflag [#allocation5], %s487_s30 }
 0x4e0   : > { %p636_p0 = pnand %p645_p8, %p1112_p12 }
 0x4e2   : > { %831 = dma.done.wait (!%p636_p0), %s488_s7, 128  }
 0x4e3   : > { %833 = vsyncadd (!%p636_p0), %s488_s7, 4294967168  ;;  %p18_p11 = scmp.ge.s32.totalorder %s916_s23, 10   ;;  %s1113_s18 = smov %s840_s19 }
 0x4e4   : > { %s1114_s19 = smov %s844_s1  ;;  %s1115_s1 = smov %s927_s26 }
 0x4e5   : > { %s1116_s20 = smov %s916_s23  ;;  %20 = sbr.rel (!%p18_p11) target bundleno = 5 (0x5), region = 91 }
 0x4ec   :  { %493 = vsyncpa [#allocation4], 1 }
 0x4ed   :  { %495 = vsyncpa [#allocation4 + $0x1], 1 }
 0x4ee   :  { %496 = vsyncpa [#allocation5], 1 }
 0x4ef   :  { %498 = vsyncpa [#allocation5 + $0x1], 1 }
 0x4f0   :  { %499 = vsyncpa [#allocation8], 1 }

</bundles_post_ra>
